<compile_context>
chip_gen: v7x
topology: tpu7x:2x2x1
jax: 0.10.0
libtpu: 0.0.40
codegen_flags: <defaults>
</compile_context>

<pallas_src>
import functools
import math

import jax
import jax.numpy as jnp
from jax import lax
from jax.experimental import pallas as pl
from jax.experimental.pallas import tpu as pltpu


def _assoc_loss_kernel(a_ref, b_ref, yc_ref, yr_ref, out_ref, *,
                       walker_weight, visit_weight):
    a = a_ref[...]                       # (Gb, Ns, D) native dtype (bf16/f32)
    b = b_ref[...]                       # (Gb, Nt, D) native dtype
    gb, ns, _ = a.shape
    nt = b.shape[1]

    # M[g] = A[g] @ B[g]^T : batched MXU matmul, f32 accumulation.
    m = lax.dot_general(a, b,
                        dimension_numbers=(((2,), (2,)), ((0,), (0,))),
                        preferred_element_type=jnp.float32)       # (Gb,Ns,Nt)

    # P_{s->t} = softmax over targets (lane axis); one EUP reciprocal per row.
    e_row = jnp.exp(m - jnp.max(m, axis=2, keepdims=True))
    p_st = e_row * pl.reciprocal(jnp.sum(e_row, axis=2, keepdims=True),
                                 approx=True)                     # (Gb,Ns,Nt)

    # P_{t->s}^T = softmax over sources (sublane axis), kept in (Ns,Nt) layout.
    e_col = jnp.exp(m - jnp.max(m, axis=1, keepdims=True))
    p_ts_t = e_col * pl.reciprocal(jnp.sum(e_col, axis=1, keepdims=True),
                                   approx=True)                   # (Gb,Ns,Nt)

    # P_{s->t->s}[g] = P_{s->t}[g] @ P_{t->s}[g] = P_st @ (P_ts^T)^T.
    p_sts = lax.dot_general(p_st, p_ts_t,
                            dimension_numbers=(((2,), (2,)), ((0,), (0,))),
                            preferred_element_type=jnp.float32)   # (Gb,Ns,Ns)

    # ---- visit loss: KL(V || P_visit), 'sum' reduction, / V.size(0) == 1 ---
    p_visit = jnp.sum(p_st, axis=1, keepdims=True) * (1.0 / float(ns))  # (Gb,1,Nt)
    v = 1.0 / float(nt)
    visit = v * jnp.sum(math.log(v) - jnp.log(1e-08 + p_visit),
                        axis=2, keepdims=True)                    # (Gb,1,1)

    # ---- walker loss: KL(T || P_sts), 'sum' reduction, / Ns ----------------
    # eq built in-kernel from int32 labels (no Ns^2 HBM traffic / VMEM block).
    eq = (yc_ref[...] == yr_ref[...]).astype(jnp.float32)         # (Gb,Ns,Ns)
    rs = jnp.sum(eq, axis=2, keepdims=True)                       # (Gb,Ns,1)
    inv_rs = pl.reciprocal(rs, approx=True)                       # (Gb,Ns,1)
    log_p = jnp.log(1e-08 + p_sts)                                # (Gb,Ns,Ns)
    # Each T row sums to 1, so sum_ij T*logT == sum_i -log(rs_i) exactly.
    t_logt = -jnp.sum(jnp.log(rs), axis=1, keepdims=True)         # (Gb,1,1)
    cross = jnp.sum(jnp.sum(eq * (inv_rs * log_p), axis=2, keepdims=True),
                    axis=1, keepdims=True)                        # (Gb,1,1)
    walker = (t_logt - cross) * (1.0 / float(ns))                 # (Gb,1,1)

    out_ref[...] = visit_weight * visit + walker_weight * walker  # (Gb,1,1)


def _vmem_budget_bytes():
    """Generation-aware scoped-VMEM budget (~48 MiB on v7x, ~96 MiB on v5e/v6e)."""
    cap = 64 << 20                       # conservative default (v7x per-core VMEM)
    try:
        cap = int(getattr(pltpu.get_tpu_info(), "vmem_capacity_bytes", cap))
    except Exception:
        pass
    return int(min(96 << 20, max(16 << 20, (cap * 3) // 4)))


def _step_bytes(gb, ns, nt, d, itemsize):
    """Rough per-grid-step VMEM footprint: double-buffered I/O + f32 work."""
    io = 2 * gb * ((ns + nt) * d * itemsize + 2 * ns * 4 + 4)
    work = 4 * gb * (6 * ns * nt + 4 * ns * ns + 8 * (ns + nt) + 8)
    return io + work


def _choose_gb(g, ns, nt, d, itemsize, budget):
    """Largest divisor of g whose (2x head-roomed) footprint fits the budget."""
    best = 1
    for gb in range(1, g + 1):
        if g % gb == 0 and 2 * _step_bytes(gb, ns, nt, d, itemsize) <= budget:
            best = gb
    return best


def assoc_loss_batched(A, B, y, walker_weight=1.0, visit_weight=0.1):
    """Batched association loss.  A:[G,Ns,D], B:[G,Nt,D], y:[G,Ns] -> [G] f32."""
    G, Ns, D = A.shape
    _, Nt, _ = B.shape

    # Labels go in as two tiny int32 views; the (Ns,Ns) equality matrix is
    # built inside the kernel.
    y_i = y.astype(jnp.int32)
    y_col = y_i.reshape(G, Ns, 1)
    y_row = y_i.reshape(G, 1, Ns)

    budget = _vmem_budget_bytes()
    itemsize = jnp.dtype(A.dtype).itemsize
    Gb = _choose_gb(G, Ns, Nt, D, itemsize, budget)
    vmem_limit = int(min(budget,
                         max(16 << 20, 2 * _step_bytes(Gb, Ns, Nt, D, itemsize))))

    kernel = functools.partial(_assoc_loss_kernel,
                               walker_weight=float(walker_weight),
                               visit_weight=float(visit_weight))

    out = pl.pallas_call(
        kernel,
        out_shape=jax.ShapeDtypeStruct((G, 1, 1), jnp.float32),
        grid=(G // Gb,),
        in_specs=[
            pl.BlockSpec((Gb, Ns, D), lambda g: (g, 0, 0)),   # A (native dtype)
            pl.BlockSpec((Gb, Nt, D), lambda g: (g, 0, 0)),   # B (native dtype)
            pl.BlockSpec((Gb, Ns, 1), lambda g: (g, 0, 0)),   # y column view
            pl.BlockSpec((Gb, 1, Ns), lambda g: (g, 0, 0)),   # y row view
        ],
        out_specs=pl.BlockSpec((Gb, 1, 1), lambda g: (g, 0, 0)),
        compiler_params=pltpu.CompilerParams(
            dimension_semantics=("parallel",),
            vmem_limit_bytes=vmem_limit,
        ),
    )(A, B, y_col, y_row)
    return out.reshape(G)


def assoc_loss(A, B, y, walker_weight=1.0, visit_weight=0.1):
    """JAX/Pallas equivalent of assoc_loss.forward(A, B, y). Returns scalar f32."""
    return assoc_loss_batched(A[None], B[None], y[None],
                              walker_weight=walker_weight,
                              visit_weight=visit_weight)[0]


def _assoc_loss_ref(A, B, y, walker_weight=1.0, visit_weight=0.1):
    """Pure-JAX reference mirroring the PyTorch forward (for verification)."""
    M = A @ B.T
    P_st = jax.nn.softmax(M, axis=1)
    P_ts = jax.nn.softmax(M.T, axis=1)
    P_sts = P_st @ P_ts
    P_visit = jnp.mean(P_st, axis=0, keepdims=True)

    nt = B.shape[0]
    V = jnp.full((1, nt), 1.0 / nt, dtype=jnp.float32)
    visit = jnp.sum(V * (jnp.log(V) - jnp.log(1e-08 + P_visit)))  # / 1

    eq = (y.reshape(-1, 1) == y.reshape(1, -1)).astype(jnp.float32)
    T = eq / jnp.sum(eq, axis=1, keepdims=True)
    safe_T = jnp.where(T > 0, T, 1.0)
    walker = jnp.sum(jnp.where(T > 0,
                               T * (jnp.log(safe_T) - jnp.log(1e-08 + P_sts)),
                               0.0))
    walker = walker / A.shape[0]
    return visit_weight * visit + walker_weight * walker


if __name__ == "__main__":
    G, Ns, Nt, D, n_classes = 8, 8, 16, 32, 4

    key = jax.random.PRNGKey(0)
    ka, kb, ky = jax.random.split(key, 3)
    A = jax.random.normal(ka, (G, Ns, D), dtype=jnp.float32)
    B = jax.random.normal(kb, (G, Nt, D), dtype=jnp.float32)
    y = jax.random.randint(ky, (G, Ns), 0, n_classes, dtype=jnp.int32)

    # Batched f32 path (Gb instances per grid step).
    losses = jax.block_until_ready(assoc_loss_batched(A, B, y, 1.0, 0.1))
    refs = jnp.stack([_assoc_loss_ref(A[g], B[g], y[g], 1.0, 0.1)
                      for g in range(G)])
    # approx=True EUP reciprocals trade the exact-f32 1e-5 tolerance for ~1e-3;
    # validated here at 1e-2 (still catches any formula / scaling error).
    assert jnp.allclose(losses, refs, rtol=1e-2, atol=1e-2), (losses, refs)

    # Single-instance API (matches the PyTorch module's forward signature).
    l0 = jax.block_until_ready(assoc_loss(A[0], B[0], y[0], 1.0, 0.1))
    assert jnp.allclose(l0, refs[0], rtol=1e-2, atol=1e-2), (l0, refs[0])

    # bf16 embeddings go straight into the MXU (f32 accumulation), no upcast.
    A16, B16 = A.astype(jnp.bfloat16), B.astype(jnp.bfloat16)
    losses16 = jax.block_until_ready(assoc_loss_batched(A16, B16, y, 1.0, 0.1))
    refs16 = jnp.stack([_assoc_loss_ref(A16[g].astype(jnp.float32),
                                        B16[g].astype(jnp.float32),
                                        y[g], 1.0, 0.1) for g in range(G)])
    assert jnp.allclose(losses16, refs16, rtol=2e-2, atol=2e-2), (losses16, refs16)

    print("KERNEL_OK")
</pallas_src>

<mosaic_0001>
module attributes {stable_mosaic.version = 11 : i64} {
  func.func @_assoc_loss_kernel(%arg0: i32, %arg1: memref<8x8x32xf32, #tpu.memory_space<vmem>>, %arg2: memref<8x16x32xf32, #tpu.memory_space<vmem>>, %arg3: memref<8x8x1xi32, #tpu.memory_space<vmem>>, %arg4: memref<8x1x8xi32, #tpu.memory_space<vmem>>, %arg5: memref<8x1x1xf32, #tpu.memory_space<vmem>>) attributes {dimension_semantics = [#tpu.dimension_semantics<parallel>], iteration_bounds = array<i64: 1>, scalar_prefetch = 0 : i64, scratch_operands = 0 : i64, tpu.core_type = #tpu.core_type<tc>, window_params = [{transform_indices = @transform_0, window_bounds = array<i64: 8, 8, 32>}, {transform_indices = @transform_1, window_bounds = array<i64: 8, 16, 32>}, {transform_indices = @transform_2, window_bounds = array<i64: 8, 8, 1>}, {transform_indices = @transform_3, window_bounds = array<i64: 8, 1, 8>}, {transform_indices = @transform_4, window_bounds = array<i64: 8, 1, 1>}]} {
    %c0 = arith.constant 0 : index
    %c0_0 = arith.constant 0 : index
    %c0_1 = arith.constant 0 : index
    %0 = vector.load %arg1[%c0, %c0_0, %c0_1] : memref<8x8x32xf32, #tpu.memory_space<vmem>>, vector<8x8x32xf32>
    %c0_2 = arith.constant 0 : index
    %c0_3 = arith.constant 0 : index
    %c0_4 = arith.constant 0 : index
    %1 = vector.load %arg2[%c0_2, %c0_3, %c0_4] : memref<8x16x32xf32, #tpu.memory_space<vmem>>, vector<8x16x32xf32>
    %cst = arith.constant dense<0.000000e+00> : vector<8x8x16xf32>
    %2 = tpu.matmul %0, %1, %cst {dimension_numbers = #tpu.dot_dimension_numbers<[2], [2], [1], [1], [0, 0, 0, 1, 1, 1], [0], [0]>} : vector<8x8x32xf32>, vector<8x16x32xf32>, vector<8x8x16xf32> -> vector<8x8x16xf32>
    %cst_5 = arith.constant dense<0xFF800000> : vector<8x8xf32>
    %3 = vector.multi_reduction <maximumf>, %2, %cst_5 [2] : vector<8x8x16xf32> to vector<8x8xf32>
    %4 = vector.shape_cast %3 : vector<8x8xf32> to vector<8x8x1xf32>
    %5 = vector.broadcast %4 : vector<8x8x1xf32> to vector<8x8x16xf32>
    %6 = arith.subf %2, %5 : vector<8x8x16xf32>
    %7 = math.exp %6 : vector<8x8x16xf32>
    %cst_6 = arith.constant dense<0.000000e+00> : vector<8x8xf32>
    %8 = vector.multi_reduction <add>, %7, %cst_6 [2] : vector<8x8x16xf32> to vector<8x8xf32>
    %9 = vector.shape_cast %8 : vector<8x8xf32> to vector<8x8x1xf32>
    %10 = tpu.reciprocal %9 {approx = true} : vector<8x8x1xf32> -> vector<8x8x1xf32>
    %11 = vector.broadcast %10 : vector<8x8x1xf32> to vector<8x8x16xf32>
    %12 = arith.mulf %7, %11 : vector<8x8x16xf32>
    %cst_7 = arith.constant dense<0xFF800000> : vector<8x16xf32>
    %13 = vector.multi_reduction <maximumf>, %2, %cst_7 [1] : vector<8x8x16xf32> to vector<8x16xf32>
    %14 = vector.shape_cast %13 : vector<8x16xf32> to vector<8x1x16xf32>
    %15 = vector.broadcast %14 : vector<8x1x16xf32> to vector<8x8x16xf32>
    %16 = arith.subf %2, %15 : vector<8x8x16xf32>
    %17 = math.exp %16 : vector<8x8x16xf32>
    %cst_8 = arith.constant dense<0.000000e+00> : vector<8x16xf32>
    %18 = vector.multi_reduction <add>, %17, %cst_8 [1] : vector<8x8x16xf32> to vector<8x16xf32>
    %19 = vector.shape_cast %18 : vector<8x16xf32> to vector<8x1x16xf32>
    %20 = tpu.reciprocal %19 {approx = true} : vector<8x1x16xf32> -> vector<8x1x16xf32>
    %21 = vector.broadcast %20 : vector<8x1x16xf32> to vector<8x8x16xf32>
    %22 = arith.mulf %17, %21 : vector<8x8x16xf32>
    %cst_9 = arith.constant dense<0.000000e+00> : vector<8x8x8xf32>
    %23 = tpu.matmul %12, %22, %cst_9 {dimension_numbers = #tpu.dot_dimension_numbers<[2], [2], [1], [1], [0, 0, 0, 1, 1, 1], [0], [0]>} : vector<8x8x16xf32>, vector<8x8x16xf32>, vector<8x8x8xf32> -> vector<8x8x8xf32>
    %cst_10 = arith.constant dense<0.000000e+00> : vector<8x16xf32>
    %24 = vector.multi_reduction <add>, %12, %cst_10 [1] : vector<8x8x16xf32> to vector<8x16xf32>
    %25 = vector.shape_cast %24 : vector<8x16xf32> to vector<8x1x16xf32>
    %cst_11 = arith.constant 1.250000e-01 : f32
    %26 = vector.broadcast %cst_11 : f32 to vector<8x1x16xf32>
    %27 = arith.mulf %25, %26 : vector<8x1x16xf32>
    %cst_12 = arith.constant 9.99999993E-9 : f32
    %28 = vector.broadcast %cst_12 : f32 to vector<8x1x16xf32>
    %29 = arith.addf %28, %27 : vector<8x1x16xf32>
    %30 = math.log %29 : vector<8x1x16xf32>
    %cst_13 = arith.constant -2.77258873 : f32
    %31 = vector.broadcast %cst_13 : f32 to vector<8x1x16xf32>
    %32 = arith.subf %31, %30 : vector<8x1x16xf32>
    %cst_14 = arith.constant dense<0.000000e+00> : vector<8x1xf32>
    %33 = vector.multi_reduction <add>, %32, %cst_14 [2] : vector<8x1x16xf32> to vector<8x1xf32>
    %34 = vector.shape_cast %33 : vector<8x1xf32> to vector<8x1x1xf32>
    %cst_15 = arith.constant 6.250000e-02 : f32
    %35 = vector.broadcast %cst_15 : f32 to vector<8x1x1xf32>
    %36 = arith.mulf %35, %34 : vector<8x1x1xf32>
    %c0_16 = arith.constant 0 : index
    %c0_17 = arith.constant 0 : index
    %c0_18 = arith.constant 0 : index
    %37 = vector.load %arg3[%c0_16, %c0_17, %c0_18] : memref<8x8x1xi32, #tpu.memory_space<vmem>>, vector<8x8x1xi32>
    %c0_19 = arith.constant 0 : index
    %c0_20 = arith.constant 0 : index
    %c0_21 = arith.constant 0 : index
    %38 = vector.load %arg4[%c0_19, %c0_20, %c0_21] : memref<8x1x8xi32, #tpu.memory_space<vmem>>, vector<8x1x8xi32>
    %39 = vector.broadcast %37 : vector<8x8x1xi32> to vector<8x8x8xi32>
    %40 = vector.broadcast %38 : vector<8x1x8xi32> to vector<8x8x8xi32>
    %41 = arith.cmpi eq, %39, %40 : vector<8x8x8xi32>
    %42 = arith.extui %41 : vector<8x8x8xi1> to vector<8x8x8xi32>
    %43 = arith.sitofp %42 : vector<8x8x8xi32> to vector<8x8x8xf32>
    %cst_22 = arith.constant dense<0.000000e+00> : vector<8x8xf32>
    %44 = vector.multi_reduction <add>, %43, %cst_22 [2] : vector<8x8x8xf32> to vector<8x8xf32>
    %45 = vector.shape_cast %44 : vector<8x8xf32> to vector<8x8x1xf32>
    %46 = tpu.reciprocal %45 {approx = true} : vector<8x8x1xf32> -> vector<8x8x1xf32>
    %cst_23 = arith.constant 9.99999993E-9 : f32
    %47 = vector.broadcast %cst_23 : f32 to vector<8x8x8xf32>
    %48 = arith.addf %47, %23 : vector<8x8x8xf32>
    %49 = math.log %48 : vector<8x8x8xf32>
    %50 = math.log %45 : vector<8x8x1xf32>
    %cst_24 = arith.constant dense<0.000000e+00> : vector<8x1xf32>
    %51 = vector.multi_reduction <add>, %50, %cst_24 [1] : vector<8x8x1xf32> to vector<8x1xf32>
    %52 = vector.shape_cast %51 : vector<8x1xf32> to vector<8x1x1xf32>
    %cst_25 = arith.constant 0.000000e+00 : f32
    %53 = vector.broadcast %cst_25 : f32 to vector<8x1x1xf32>
    %54 = arith.subf %53, %52 : vector<8x1x1xf32>
    %55 = vector.broadcast %46 : vector<8x8x1xf32> to vector<8x8x8xf32>
    %56 = arith.mulf %55, %49 : vector<8x8x8xf32>
    %57 = arith.mulf %43, %56 : vector<8x8x8xf32>
    %cst_26 = arith.constant dense<0.000000e+00> : vector<8x8xf32>
    %58 = vector.multi_reduction <add>, %57, %cst_26 [2] : vector<8x8x8xf32> to vector<8x8xf32>
    %59 = vector.shape_cast %58 : vector<8x8xf32> to vector<8x8x1xf32>
    %cst_27 = arith.constant dense<0.000000e+00> : vector<8x1xf32>
    %60 = vector.multi_reduction <add>, %59, %cst_27 [1] : vector<8x8x1xf32> to vector<8x1xf32>
    %61 = vector.shape_cast %60 : vector<8x1xf32> to vector<8x1x1xf32>
    %62 = arith.subf %54, %61 : vector<8x1x1xf32>
    %cst_28 = arith.constant 1.250000e-01 : f32
    %63 = vector.broadcast %cst_28 : f32 to vector<8x1x1xf32>
    %64 = arith.mulf %62, %63 : vector<8x1x1xf32>
    %cst_29 = arith.constant 1.000000e-01 : f32
    %65 = vector.broadcast %cst_29 : f32 to vector<8x1x1xf32>
    %66 = arith.mulf %65, %36 : vector<8x1x1xf32>
    %cst_30 = arith.constant 1.000000e+00 : f32
    %67 = vector.broadcast %cst_30 : f32 to vector<8x1x1xf32>
    %68 = arith.mulf %67, %64 : vector<8x1x1xf32>
    %69 = arith.addf %66, %68 : vector<8x1x1xf32>
    %c0_31 = arith.constant 0 : index
    %c0_32 = arith.constant 0 : index
    %c0_33 = arith.constant 0 : index
    %70 = vector.load %arg5[%c0_31, %c0_32, %c0_33] : memref<8x1x1xf32, #tpu.memory_space<vmem>>, vector<8x1x1xf32>
    tpu.vector_store %arg5[%c0_31, %c0_32, %c0_33], %69 {strides = array<i32>} : memref<8x1x1xf32, #tpu.memory_space<vmem>>, vector<8x1x1xf32>,
    return
  }
  func.func @transform_0(%arg0: i32) -> (i32, i32, i32) {
    %c0_i32 = arith.constant 0 : i32
    %c0_i32_0 = arith.constant 0 : i32
    %c0_i32_1 = arith.constant 0 : i32
    return %arg0, %c0_i32, %c0_i32_0 : i32, i32, i32
  }
  func.func @transform_1(%arg0: i32) -> (i32, i32, i32) {
    %c0_i32 = arith.constant 0 : i32
    %c0_i32_0 = arith.constant 0 : i32
    %c0_i32_1 = arith.constant 0 : i32
    return %arg0, %c0_i32, %c0_i32_0 : i32, i32, i32
  }
  func.func @transform_2(%arg0: i32) -> (i32, i32, i32) {
    %c0_i32 = arith.constant 0 : i32
    %c0_i32_0 = arith.constant 0 : i32
    %c0_i32_1 = arith.constant 0 : i32
    return %arg0, %c0_i32, %c0_i32_0 : i32, i32, i32
  }
  func.func @transform_3(%arg0: i32) -> (i32, i32, i32) {
    %c0_i32 = arith.constant 0 : i32
    %c0_i32_0 = arith.constant 0 : i32
    %c0_i32_1 = arith.constant 0 : i32
    return %arg0, %c0_i32, %c0_i32_0 : i32, i32, i32
  }
  func.func @transform_4(%arg0: i32) -> (i32, i32, i32) {
    %c0_i32 = arith.constant 0 : i32
    %c0_i32_0 = arith.constant 0 : i32
    %c0_i32_1 = arith.constant 0 : i32
    return %arg0, %c0_i32, %c0_i32_0 : i32, i32, i32
  }
}

</mosaic_0001>

<bundles_post_ra>
// kernel: tpu_custom_call.1
= control target key start
LH: loop header
LB: loop body
LE: loop exit
PB: predicated region body
PF: predicated region fallthrough
CT: control target
= control target key end

     0   :  { %9 = vsyncpa [#allocation3], 0  ;;  %s2393_s15 = smov [#allocation2]   ;;  %s2903_s0 = inlined_call_operand.vmem [shape: f32[8,8,32], index: 0, kind: input, shape index: {}]   ;;  %s2904_s1 = inlined_call_operand.hbm [shape: f32[8,16,32], index: 1, kind: input, shape index: {}]   ;;  %s2905_s2 = inlined_call_operand.vmem [shape: s32[8,8,1], index: 2, kind: input, shape index: {}]   ;;  %s2906_s3 = inlined_call_operand.vmem [shape: s32[8,1,8], index: 3, kind: input, shape index: {}]   ;;  %s2907_s4 = inlined_call_operand.vmem [shape: f32[8,1,1], index: 4, kind: output, shape index: {}]  }
   0x1   :  { %s17_s16 = sshll.u32 %s2393_s15, 4  ;;  %s2369_s19 = scalar_lea.hbm %s2904_s1, 2048  ;;  %s18_s16 = int_to_ptr.vmem [resolvable:$true] %s17_s16 }
   0x2   :  { %p2370_p0 = scmp.ne.s32.totalorder %s2904_s1, %s2369_s19  ;;  %p2373_p1 = scmp.lt.u32.totalorder %s2369_s19, %s2904_s1 }
   0x4   :  { %p2375_p2 = pnand %p2373_p1, %p2370_p0 }
   0x6   :  { %2378 = shalt.err (!%p2375_p2)
}
   0x7   :  { %s2379_s24 = scalar_lea.vmem %s18_s16, 2048  ;;  %p2384_p4 = scmp.lt.s32.totalorder %s18_s16, %s18_s16 }
   0x8   :  { %p2380_p3 = scmp.ne.s32.totalorder %s18_s16, %s2379_s24  ;;  %p2385_p5 = scmp.lt.s32.totalorder %s2379_s24, %s2379_s24 }
   0xa   :  { %p2386_p6 = por %p2385_p5, %p2384_p4 }
   0xc   :  { %p2387_p7 = pnand %p2386_p6, %p2380_p3 }
   0xe   :  { %2390 = shalt.err (!%p2387_p7)
}
   0xf   :  { %s2394_s25 = smov 128   ;;  %s2395_s26 = smov 8  }
  0x10   :  { %23 = dma.hbm_to_vmem [thread:$0]  %s2904_s1, 2048, %s18_s16, [#allocation3], %s2394_s25, %s2394_s25, %s2395_s26  }
  0x11   :  { %2391 = dma.done.wait [#allocation3], 2048  }
  0x12   :  { %2392 = vsyncadd [#allocation3], 4294965248  ;;  %v2396_v0 = vmov 0.0|0.0   ;;  %vm2397_vm0 = vmmov 0   ;;  %v2398_v1 = vmov 0.0   ;;  %vm55_vm1 = vcmask 261120  }
  0x13   :  { %2200 = vmatprep.subr.bf16.mxu0 %v2396_v0  ;;  %2204 = vmatprep.subr.bf16.mxu1 %v2396_v0  ;;  %vm2443_vm2 = vmpackc.low %vm55_vm1, %vm55_vm1  ;;  %v39_v3 = vld [vmem:[#allocation2] sm:$0xff]  ;;  %v40_v4 = vld [vmem:[#allocation2 + $0x8] sm:$0xff]  ;;  %vm688_vm3 = vcmask 130048   ;;  %vm1145_vm4 = vcmask 64512   ;;  %vm1994_vm13 = vcmask 0  }
  0x14   :  { %2108 = vmatprep.mubr.msk.f32.mxu0 %vm2397_vm0, %v2398_v1  ;;  %2115 = vmatprep.mubr.msk.f32.mxu1 %vm2397_vm0, %v2398_v1  ;;  %v41_v5 = vld [vmem:[#allocation2 + $0x10] sm:$0xff]  ;;  %v2201_v6 = vpack.c.bf16 %v40_v4, %v39_v3  ;;  %v42_v7 = vld [vmem:[#allocation2 + $0x18] sm:$0xff]  ;;  %v43_v9 = vld [vmem:[#allocation2 + $0x20] sm:$0xff] }
  0x15   :  { %v2205_v8 = vpack.c.bf16 %v42_v7, %v41_v5  ;;  %v44_v10 = vld [vmem:[#allocation2 + $0x28] sm:$0xff]  ;;  %v45_v11 = vld [vmem:[#allocation2 + $0x30] sm:$0xff]  ;;  %v46_v12 = vld [vmem:[#allocation2 + $0x38] sm:$0xff] }
  0x16   :  { %2203 = vmatpush3.bf16.xpose.msk.msra.mxu0 %vm2443_vm2, %v2201_v6  ;;  %v31_v13 = vld [vmem:[%s2903_s0] sm:$0xff]  ;;  %v2209_v14 = vpack.c.bf16 %v44_v10, %v43_v9  ;;  %v32_v15 = vld [vmem:[%s2903_s0 + $0x8] sm:$0xff]  ;;  %v2213_v16 = vpack.c.bf16 %v46_v12, %v45_v11  ;;  %v49_v19 = vld [vmem:[#allocation2 + $0x50] sm:$0xff] }
  0x17   :  { %2207 = vmatpush3.bf16.xpose.msk.msra.mxu1 %vm2443_vm2, %v2205_v8  ;;  %2208 = vmatprep.subr.bf16.mxu0 %v2396_v0  ;;  %v47_v17 = vld [vmem:[#allocation2 + $0x40] sm:$0xff]  ;;  %v48_v18 = vld [vmem:[#allocation2 + $0x48] sm:$0xff]  ;;  %v50_v20 = vld [vmem:[#allocation2 + $0x58] sm:$0xff] }
  0x18   :  { %2212 = vmatprep.subr.bf16.mxu1 %v2396_v0  ;;  %v33_v21 = vld [vmem:[%s2903_s0 + $0x10] sm:$0xff]  ;;  %v2217_v22 = vpack.c.bf16 %v48_v18, %v47_v17  ;;  %v34_v23 = vld [vmem:[%s2903_s0 + $0x18] sm:$0xff]  ;;  %v2221_v24 = vpack.c.bf16 %v50_v20, %v49_v19  ;;  %v51_v25 = vld [vmem:[#allocation2 + $0x60] sm:$0xff] }
  0x19   :  { %v52_v26 = vld [vmem:[#allocation2 + $0x68] sm:$0xff]  ;;  %v53_v27 = vld [vmem:[#allocation2 + $0x70] sm:$0xff]  ;;  %v54_v28 = vld [vmem:[#allocation2 + $0x78] sm:$0xff] }
  0x1a   :  { %v35_v29 = vld [vmem:[%s2903_s0 + $0x20] sm:$0xff]  ;;  %v2225_v30 = vpack.c.bf16 %v52_v26, %v51_v25  ;;  %v36_v31 = vld [vmem:[%s2903_s0 + $0x28] sm:$0xff]  ;;  %v2229_v32 = vpack.c.bf16 %v54_v28, %v53_v27  ;;  %v37_v33 = vld [vmem:[%s2903_s0 + $0x30] sm:$0xff] }
  0x1b   :  { %v38_v34 = vld [vmem:[%s2903_s0 + $0x38] sm:$0xff] }
  0x1d   :  { %2109 = vmatmul.mubr.msk.f32.vlgmr.msra.gmra.mrb[0].mxu0 %vm55_vm1, %v31_v13 }
  0x1e   :  { %2116 = vmatmul.mubr.msk.f32.vlgmr.msra.gmra.mrb[0].mxu1 %vm55_vm1, %v32_v15  ;;  %2211 = vmatpush3.bf16.xpose.msk.msra.mxu0 %vm2443_vm2, %v2209_v14 }
  0x1f   :  { %2215 = vmatpush3.bf16.xpose.msk.msra.mxu1 %vm2443_vm2, %v2213_v16  ;;  %2122 = vmatprep.mubr.msk.f32.mxu0 %vm2397_vm0, %v2398_v1 }
  0x20   :  { %2129 = vmatprep.mubr.msk.f32.mxu1 %vm2397_vm0, %v2398_v1  ;;  %2216 = vmatprep.subr.bf16.mxu0 %v2396_v0 }
  0x21   :  { %2220 = vmatprep.subr.bf16.mxu1 %v2396_v0 }
  0x25   :  { %2123 = vmatmul.mubr.msk.f32.vlgmr.msra.gmra.mrb[2].mxu0 %vm55_vm1, %v33_v21 }
  0x26   :  { %2130 = vmatmul.mubr.msk.f32.vlgmr.msra.gmra.mrb[2].mxu1 %vm55_vm1, %v34_v23  ;;  %2219 = vmatpush3.bf16.xpose.msk.msra.mxu0 %vm2443_vm2, %v2217_v22 }
  0x27   :  { %2223 = vmatpush3.bf16.xpose.msk.msra.mxu1 %vm2443_vm2, %v2221_v24  ;;  %2136 = vmatprep.mubr.msk.f32.mxu0 %vm2397_vm0, %v2398_v1 }
  0x28   :  { %2143 = vmatprep.mubr.msk.f32.mxu1 %vm2397_vm0, %v2398_v1  ;;  %2224 = vmatprep.subr.bf16.mxu0 %v2396_v0 }
  0x29   :  { %2228 = vmatprep.subr.bf16.mxu1 %v2396_v0 }
  0x2d   :  { %2137 = vmatmul.mubr.msk.f32.vlgmr.msra.gmra.mrb[4].mxu0 %vm55_vm1, %v35_v29 }
  0x2e   :  { %2144 = vmatmul.mubr.msk.f32.vlgmr.msra.gmra.mrb[4].mxu1 %vm55_vm1, %v36_v31  ;;  %2227 = vmatpush3.bf16.xpose.msk.msra.mxu0 %vm2443_vm2, %v2225_v30 }
  0x2f   :  { %2231 = vmatpush3.bf16.xpose.msk.msra.mxu1 %vm2443_vm2, %v2229_v32  ;;  %2150 = vmatprep.mubr.msk.f32.mxu0 %vm2397_vm0, %v2398_v1 }
  0x30   :  { %2157 = vmatprep.mubr.msk.f32.mxu1 %vm2397_vm0, %v2398_v1  ;;  %2160 = vmatprep.subr.mxu0 %v2398_v1 }
  0x31   :  { %2165 = vmatprep.subr.mxu1 %v2398_v1 }
  0x35   :  { %2151 = vmatmul.mubr.msk.f32.vlgmr.msra.gmra.mrb[6].mxu0 %vm55_vm1, %v37_v33 }
  0x36   :  { %2158 = vmatmul.mubr.msk.f32.vlgmr.msra.gmra.mrb[6].mxu1 %vm55_vm1, %v38_v34  ;;  %2162 = vmatprep.mubr.msk.f32.mxu0 %vm2397_vm0, %v2398_v1 }
  0x37   :  { %2167 = vmatprep.mubr.msk.f32.mxu1 %vm2397_vm0, %v2398_v1 }
  0xf0   :  { %v2513_v35 = vpop.f32.mrb[0].mxu0 }
  0xf1   :  { %v2515_v36 = vpop.f32.mrb[0].mxu1  ;;  %v2110_v37 = vpop.f32.mrb[1].mxu0  ;;  %v689_v38 = vsel %vm688_vm3, %v2513_v35, -inf }
  0xf2   :  { %v2117_v39 = vpop.f32.mrb[1].mxu1  ;;  %690 = vmax.xlane.f32.xlu0 %v689_v38  ;;  %v777_v40 = vrot.slane %v689_v38, 4  ;;  %v692_v41 = vsel %vm688_vm3, %v2515_v36, -inf }
  0xf3   :  { %v783_v42 = vrot.slane %v692_v41, 4 }
  0xf4   :  { %v778_v43 = vmax.f32 %v689_v38, %v777_v40 }
  0xf5   :  { %v784_v44 = vmax.f32 %v692_v41, %v783_v42 }
  0xf6   :  { %v779_v45 = vrot.slane %v778_v43, 2  ;;  %693 = vmax.xlane.f32.xlu0 %v692_v41 }
  0xf7   :  { %v785_v46 = vrot.slane %v784_v44, 2 }
  0xf8   :  { %v780_v47 = vmax.f32 %v778_v43, %v779_v45  ;;  %v2521_v48 = vpop.f32.mrb[2].mxu0 }
  0xf9   :  { %v786_v49 = vmax.f32 %v784_v44, %v785_v46  ;;  %v2523_v50 = vpop.f32.mrb[2].mxu1  ;;  %v2124_v51 = vpop.f32.mrb[3].mxu0  ;;  %v695_v52 = vsel %vm688_vm3, %v2521_v48, -inf }
  0xfa   :  { %v781_v53 = vrot.slane %v780_v47, 1  ;;  %v2131_v54 = vpop.f32.mrb[3].mxu1  ;;  %696 = vmax.xlane.f32.xlu1 %v695_v52  ;;  %v789_v55 = vrot.slane %v695_v52, 4  ;;  %v698_v56 = vsel %vm688_vm3, %v2523_v50, -inf }
  0xfb   :  { %v787_v57 = vrot.slane %v786_v49, 1  ;;  %v795_v58 = vrot.slane %v698_v56, 4 }
  0xfc   :  { %v782_v59 = vmax.f32 %v780_v47, %v781_v53  ;;  %v790_v60 = vmax.f32 %v695_v52, %v789_v55 }
  0xfd   :  { %v788_v61 = vmax.f32 %v786_v49, %v787_v57  ;;  %v796_v62 = vmax.f32 %v698_v56, %v795_v58 }
  0xfe   :  { %v825_v63 = vsub.f32 %v2513_v35, %v782_v59  ;;  %v791_v0 = vrot.slane %v790_v60, 2  ;;  %699 = vmax.xlane.f32.xlu1 %v698_v56 }
  0xff   :  { %v826_v2 = vsub.f32 %v2515_v36, %v788_v61  ;;  %v797_v3 = vrot.slane %v796_v62, 2 }
 0x100   :  { %v833_v4 = vmul.f32 1.442695, %v825_v63  ;;  %v792_v5 = vmax.f32 %v790_v60, %v791_v0  ;;  %v2531_v6 = vpop.f32.mrb[4].mxu0 }
 0x101   :  { %v835_v7 = vmul.f32 1.442695, %v826_v2  ;;  %v798_v8 = vmax.f32 %v796_v62, %v797_v3  ;;  %v2533_v9 = vpop.f32.mrb[4].mxu1  ;;  %v2138_v10 = vpop.f32.mrb[5].mxu0  ;;  %v701_v11 = vsel %vm688_vm3, %v2531_v6, -inf }
 0x102   :  { %2241 = vpow2.f32 %v833_v4  ;;  %v793_v12 = vrot.slane %v792_v5, 1  ;;  %v2145_v13 = vpop.f32.mrb[5].mxu1  ;;  %v704_v14 = vsel %vm688_vm3, %v2533_v9, -inf  ;;  %702 = vmax.xlane.f32.xlu0 %v701_v11  ;;  %v801_v15 = vrot.slane %v701_v11, 4 }
 0x103   :  { %2243 = vpow2.f32 %v835_v7  ;;  %v799_v16 = vrot.slane %v798_v8, 1  ;;  %v807_v17 = vrot.slane %v704_v14, 4  ;;  %705 = vmax.xlane.f32.xlu1 %v704_v14 }
 0x104   :  { %v2539_v18 = vmax.f32 %v792_v5, %v793_v12  ;;  %v802_v19 = vmax.f32 %v701_v11, %v801_v15 }
 0x105   :  { %v2541_v20 = vmax.f32 %v798_v8, %v799_v16  ;;  %v808_v21 = vmax.f32 %v704_v14, %v807_v17  ;;  %v2399_v17 = vmov 0  }
 0x106   :  { %v827_v22 = vsub.f32 %v2521_v48, %v2539_v18  ;;  %v803_v23 = vrot.slane %v802_v19, 2  ;;  %2240 = vset.pattern.permute.xlu1 %v2399_v17  ;;  %2239 = vset.pattern.permute.xlu0 %v2399_v17  ;;  %v1053_v17 = vld [vmem:[%s2905_s2 + $0x20] sm:$0xff] }
 0x107   :  { %v828_v24 = vsub.f32 %v2523_v50, %v2541_v20  ;;  %v809_v25 = vrot.slane %v808_v21, 2 }
 0x108   :  { %v804_v26 = vmax.f32 %v802_v19, %v803_v23  ;;  %v2547_v27 = vpop.f32.mrb[6].mxu0 }
 0x109   :  { %v810_v28 = vmax.f32 %v808_v21, %v809_v25  ;;  %v2549_v29 = vpop.f32.mrb[6].mxu1  ;;  %v2152_v30 = vpop.f32.mrb[7].mxu0  ;;  %v707_v31 = vsel %vm688_vm3, %v2547_v27, -inf }
 0x10a   :  { %v805_v32 = vrot.slane %v804_v26, 1  ;;  %v2159_v33 = vpop.f32.mrb[7].mxu1  ;;  %v710_v34 = vsel %vm688_vm3, %v2549_v29, -inf  ;;  %708 = vmax.xlane.f32.xlu0 %v707_v31  ;;  %v813_v37 = vrot.slane %v707_v31, 4 }
 0x10b   :  { %v811_v38 = vrot.slane %v810_v28, 1  ;;  %v819_v39 = vrot.slane %v710_v34, 4  ;;  %711 = vmax.xlane.f32.xlu1 %v710_v34 }
 0x10c   :  { %v2242_v40 = vpop.eup %2241  ;;  %v2555_v41 = vmax.f32 %v804_v26, %v805_v32  ;;  %v814_v42 = vmax.f32 %v707_v31, %v813_v37 }
 0x10d   :  { %v2244_v43 = vpop.eup %2243  ;;  %v849_v44 = vsel %vm688_vm3, %v2242_v40, 0.0  ;;  %v2558_v45 = vmax.f32 %v810_v28, %v811_v38  ;;  %v820_v46 = vmax.f32 %v710_v34, %v819_v39 }
 0x10e   :  { %v850_v47 = vrot.slane %v849_v44, 4  ;;  %v856_v49 = vsel %vm688_vm3, %v2244_v43, 0.0  ;;  %v829_v51 = vsub.f32 %v2531_v6, %v2555_v41  ;;  %v815_v52 = vrot.slane %v814_v42, 2 }
 0x10f   :  { %v857_v53 = vrot.slane %v856_v49, 4  ;;  %v830_v54 = vsub.f32 %v2533_v9, %v2558_v45  ;;  %v821_v55 = vrot.slane %v820_v46, 2 }
 0x110   :  { %v851_v56 = vadd.f32 %v850_v47, %v849_v44  ;;  %v816_v57 = vmax.f32 %v814_v42, %v815_v52 }
 0x111   :  { %v858_v58 = vadd.f32 %v857_v53, %v856_v49  ;;  %v822_v59 = vmax.f32 %v820_v46, %v821_v55 }
 0x112   :  { %v852_v60 = vrot.slane %v851_v56, 2  ;;  %v817_v61 = vrot.slane %v816_v57, 1 }
 0x113   :  { %v859_v62 = vrot.slane %v858_v58, 2  ;;  %v823_v63 = vrot.slane %v822_v59, 1 }
 0x114   :  { %v853_v0 = vadd.f32 %v852_v60, %v851_v56  ;;  %v2565_v2 = vmax.f32 %v816_v57, %v817_v61 }
 0x115   :  { %v860_v3 = vadd.f32 %v859_v62, %v858_v58  ;;  %v2567_v4 = vmax.f32 %v822_v59, %v823_v63 }
 0x116   :  { %v831_v5 = vsub.f32 %v2547_v27, %v2565_v2  ;;  %v854_v7 = vrot.slane %v853_v0, 1 }
 0x117   :  { %v832_v8 = vsub.f32 %v2549_v29, %v2567_v4  ;;  %v861_v10 = vrot.slane %v860_v3, 1 }
 0x118   :  { %v855_v11 = vadd.f32 %v854_v7, %v853_v0 }
 0x119   :  { %v862_v12 = vadd.f32 %v861_v10, %v860_v3 }
 0x11a   :  { %2245 = vrcp.f32 %v855_v11 }
 0x11b   :  { %2247 = vrcp.f32 %v862_v12 }
 0x124   :  { %v2246_v13 = vpop.eup %2245 }
 0x125   :  { %v2248_v14 = vpop.eup %2247  ;;  %v913_v15 = vmul.f32 %v2246_v13, %v2242_v40  ;;  %v1050_v13 = vld [vmem:[%s2905_s2 + $0x8] sm:$0xff] }
 0x126   :  { %v914_v16 = vmul.f32 %v2248_v14, %v2244_v43  ;;  %v1051_v14 = vld [vmem:[%s2905_s2 + $0x10] sm:$0xff] }
 0x127   :  { %2161 = vmatpush3.xpose.msk.msra.mxu0 %vm688_vm3, %v913_v15  ;;  %v1049_v15 = vld [vmem:[%s2905_s2] sm:$0xff] }
 0x128   :  { %2166 = vmatpush3.xpose.msk.msra.mxu1 %vm688_vm3, %v914_v16  ;;  %2170 = vmatprep.subr.mxu0 %v2398_v1  ;;  %v1052_v16 = vld [vmem:[%s2905_s2 + $0x18] sm:$0xff] }
 0x129   :  { %2175 = vmatprep.subr.mxu1 %v2398_v1 }
 0x17f   :  { %v691_v19 = vpop.xlane.xlu0 %690 }
 0x180   :  { %v713_v21 = vsub.f32 %v2513_v35, %v691_v19  ;;  %v1054_v19 = vld [vmem:[%s2905_s2 + $0x28] sm:$0xff] }
 0x182   :  { %v721_v23 = vmul.f32 1.442695, %v713_v21  ;;  %v1055_v21 = vld [vmem:[%s2905_s2 + $0x30] sm:$0xff] }
 0x183   :  { %v694_v25 = vpop.xlane.xlu0 %693 }
 0x184   :  { %2249 = vpow2.f32 %v721_v23  ;;  %v714_v26 = vsub.f32 %v2515_v36, %v694_v25  ;;  %v1056_v23 = vld [vmem:[%s2905_s2 + $0x38] sm:$0xff]  ;;  %v837_v25 = vmul.f32 1.442695, %v827_v22 }
 0x186   :  { %v723_v28 = vmul.f32 1.442695, %v714_v26  ;;  %v839_v26 = vmul.f32 1.442695, %v828_v24 }
 0x187   :  { %v697_v30 = vpop.xlane.xlu1 %696 }
 0x188   :  { %2251 = vpow2.f32 %v723_v28  ;;  %v715_v31 = vsub.f32 %v2521_v48, %v697_v30  ;;  %v841_v28 = vmul.f32 1.442695, %v829_v51  ;;  %v843_v30 = vmul.f32 1.442695, %v830_v54 }
 0x189   :  { %v845_v48 = vmul.f32 1.442695, %v831_v5 }
 0x18a   :  { %v725_v32 = vmul.f32 1.442695, %v715_v31 }
 0x18b   :  { %v700_v33 = vpop.xlane.xlu1 %699 }
 0x18c   :  { %2253 = vpow2.f32 %v725_v32  ;;  %v716_v34 = vsub.f32 %v2523_v50, %v700_v33  ;;  %v847_v50 = vmul.f32 1.442695, %v832_v8 }
 0x18e   :  { %v2581_v37 = vpop.eup %2249  ;;  %v727_v38 = vmul.f32 1.442695, %v716_v34 }
 0x18f   :  { %v703_v39 = vpop.xlane.xlu0 %702  ;;  %v737_v35 = vsel %vm688_vm3, %v2581_v37, 0.0 }
 0x190   :  { %2255 = vpow2.f32 %v727_v38  ;;  %v706_v40 = vpop.xlane.xlu1 %705  ;;  %v717_v36 = vsub.f32 %v2531_v6, %v703_v39  ;;  %738 = vadd.xlane.f32.xlu0 %v737_v35 }
 0x191   :  { %v718_v42 = vsub.f32 %v2533_v9, %v706_v40 }
 0x192   :  { %v2587_v43 = vpop.eup %2251  ;;  %v729_v44 = vmul.f32 1.442695, %v717_v36 }
 0x193   :  { %v731_v46 = vmul.f32 1.442695, %v718_v42  ;;  %v740_v47 = vsel %vm688_vm3, %v2587_v43, 0.0 }
 0x194   :  { %2257 = vpow2.f32 %v729_v44  ;;  %741 = vadd.xlane.f32.xlu1 %v740_v47 }
 0x195   :  { %2259 = vpow2.f32 %v731_v46 }
 0x196   :  { %v2591_v49 = vpop.eup %2253 }
 0x197   :  { %v709_v52 = vpop.xlane.xlu0 %708  ;;  %v743_v53 = vsel %vm688_vm3, %v2591_v49, 0.0 }
 0x198   :  { %v712_v55 = vpop.xlane.xlu1 %711  ;;  %v719_v56 = vsub.f32 %v2547_v27, %v709_v52  ;;  %744 = vadd.xlane.f32.xlu0 %v743_v53 }
 0x199   :  { %v720_v57 = vsub.f32 %v2549_v29, %v712_v55 }
 0x19a   :  { %v2597_v58 = vpop.eup %2255  ;;  %v733_v59 = vmul.f32 1.442695, %v719_v56 }
 0x19b   :  { %v735_v60 = vmul.f32 1.442695, %v720_v57  ;;  %v746_v61 = vsel %vm688_vm3, %v2597_v58, 0.0 }
 0x19c   :  { %2261 = vpow2.f32 %v733_v59  ;;  %747 = vadd.xlane.f32.xlu1 %v746_v61 }
 0x19d   :  { %2263 = vpow2.f32 %v735_v60 }
 0x19e   :  { %v2601_v62 = vpop.eup %2257  ;;  %2265 = vpow2.f32 %v837_v25 }
 0x19f   :  { %v2603_v63 = vpop.eup %2259  ;;  %v749_v0 = vsel %vm688_vm3, %v2601_v62, 0.0  ;;  %2267 = vpow2.f32 %v839_v26 }
 0x1a0   :  { %v752_v3 = vsel %vm688_vm3, %v2603_v63, 0.0  ;;  %750 = vadd.xlane.f32.xlu0 %v749_v0  ;;  %2269 = vpow2.f32 %v841_v28 }
 0x1a1   :  { %753 = vadd.xlane.f32.xlu1 %v752_v3  ;;  %2271 = vpow2.f32 %v843_v30 }
 0x1a2   :  { %2273 = vpow2.f32 %v845_v48 }
 0x1a3   :  { %2275 = vpow2.f32 %v847_v50 }
 0x1a6   :  { %v2609_v7 = vpop.eup %2261 }
 0x1a7   :  { %v2611_v10 = vpop.eup %2263  ;;  %v755_v11 = vsel %vm688_vm3, %v2609_v7, 0.0 }
 0x1a8   :  { %v758_v12 = vsel %vm688_vm3, %v2611_v10, 0.0  ;;  %756 = vadd.xlane.f32.xlu0 %v755_v11  ;;  %v2653_v31 = vpop.eup %2265 }
 0x1a9   :  { %759 = vadd.xlane.f32.xlu1 %v758_v12  ;;  %v2661_v18 = vpop.eup %2267  ;;  %v863_v6 = vsel %vm688_vm3, %v2653_v31, 0.0 }
 0x1aa   :  { %v864_v9 = vrot.slane %v863_v6, 4  ;;  %v870_v20 = vsel %vm688_vm3, %v2661_v18, 0.0  ;;  %v2667_v22 = vpop.eup %2269 }
 0x1ab   :  { %v871_v24 = vrot.slane %v870_v20, 4  ;;  %v877_v41 = vsel %vm688_vm3, %v2667_v22, 0.0  ;;  %v2671_v29 = vpop.eup %2271 }
 0x1ac   :  { %v865_v27 = vadd.f32 %v864_v9, %v863_v6  ;;  %v878_v54 = vrot.slane %v877_v41, 4  ;;  %v2673_v2 = vpop.eup %2273  ;;  %v884_v4 = vsel %vm688_vm3, %v2671_v29, 0.0 }
 0x1ad   :  { %v872_v45 = vadd.f32 %v871_v24, %v870_v20  ;;  %v2677_v5 = vpop.eup %2275  ;;  %v885_v33 = vrot.slane %v884_v4, 4  ;;  %v891_v38 = vsel %vm688_vm3, %v2673_v2, 0.0 }
 0x1ae   :  { %v866_v51 = vrot.slane %v865_v27, 2  ;;  %v879_v34 = vadd.f32 %v878_v54, %v877_v41  ;;  %v898_v39 = vsel %vm688_vm3, %v2677_v5, 0.0  ;;  %v892_v40 = vrot.slane %v891_v38, 4 }
 0x1af   :  { %v873_v8 = vrot.slane %v872_v45, 2  ;;  %v886_v36 = vadd.f32 %v885_v33, %v884_v4  ;;  %v899_v44 = vrot.slane %v898_v39, 4 }
 0x1b0   :  { %v867_v32 = vadd.f32 %v866_v51, %v865_v27  ;;  %v880_v42 = vrot.slane %v879_v34, 2  ;;  %v893_v47 = vadd.f32 %v892_v40, %v891_v38 }
 0x1b1   :  { %v874_v35 = vadd.f32 %v873_v8, %v872_v45  ;;  %v887_v53 = vrot.slane %v886_v36, 2  ;;  %v900_v56 = vadd.f32 %v899_v44, %v898_v39 }
 0x1b2   :  { %v868_v46 = vrot.slane %v867_v32, 1  ;;  %v881_v55 = vadd.f32 %v880_v42, %v879_v34  ;;  %v894_v59 = vrot.slane %v893_v47, 2 }
 0x1b3   :  { %v875_v52 = vrot.slane %v874_v35, 1  ;;  %v888_v61 = vadd.f32 %v887_v53, %v886_v36  ;;  %v901_v0 = vrot.slane %v900_v56, 2 }
 0x1b4   :  { %v869_v57 = vadd.f32 %v868_v46, %v867_v32  ;;  %v882_v11 = vrot.slane %v881_v55, 1  ;;  %v895_v12 = vadd.f32 %v894_v59, %v893_v47 }
 0x1b5   :  { %v876_v60 = vadd.f32 %v875_v52, %v874_v35 }
 0x1b6   :  { %2277 = vrcp.f32 %v869_v57 }
 0x1ba   :  { %1069 = vperm.xlu1 %2240, %v1050_v13   ;;  %v902_v13 = vadd.f32 %v901_v0, %v900_v56 }
 0x1be   :  { %1072 = vperm.xlu1 %2240, %v1051_v14   ;;  %1066 = vperm.xlu0 %2239, %v1049_v15   ;;  %v883_v15 = vadd.f32 %v882_v11, %v881_v55 }
 0x1c0   :  { %v2278_v25 = vpop.eup %2277 }
 0x1c1   :  { %v915_v6 = vmul.f32 %v2278_v25, %v2653_v31 }
 0x1c2   :  { %1075 = vperm.xlu1 %2240, %v1052_v16   ;;  %v889_v16 = vrot.slane %v888_v61, 1 }
 0x1c6   :  { %1078 = vperm.xlu1 %2240, %v1053_v17   ;;  %v896_v17 = vrot.slane %v895_v12, 1 }
 0x1c8   :  { %v897_v28 = vadd.f32 %v896_v17, %v895_v12 }
 0x1ca   :  { %1081 = vperm.xlu1 %2240, %v1054_v19  }
 0x1ce   :  { %1084 = vperm.xlu1 %2240, %v1055_v21   ;;  %v890_v21 = vadd.f32 %v889_v16, %v888_v61 }
 0x1d2   :  { %1087 = vperm.xlu1 %2240, %v1056_v23   ;;  %v903_v23 = vrot.slane %v902_v13, 1 }
 0x1d4   :  { %v904_v50 = vadd.f32 %v903_v23, %v902_v13 }
 0x21d   :  { %v739_v3 = vpop.xlane.xlu0 %738 }
 0x21e   :  { %2279 = vrcp.f32 %v739_v3 }
 0x21f   :  { %2281 = vrcp.f32 %v876_v60 }
 0x221   :  { %v742_v14 = vpop.xlane.xlu1 %741 }
 0x222   :  { %2283 = vrcp.f32 %v742_v14 }
 0x223   :  { %2285 = vrcp.f32 %v883_v15 }
 0x225   :  { %v745_v19 = vpop.xlane.xlu0 %744 }
 0x226   :  { %2287 = vrcp.f32 %v745_v19  ;;  %v2035_v19 = vld [vmem:[%s2906_s3 + $0x3] ss:$0 sm:$0xff] }
 0x227   :  { %2289 = vrcp.f32 %v890_v21 }
 0x228   :  { %v2280_v26 = vpop.eup %2279 }
 0x229   :  { %v769_v30 = vmul.f32 %v2280_v26, %v2581_v37  ;;  %v748_v48 = vpop.xlane.xlu1 %747  ;;  %v2282_v9 = vpop.eup %2281 }
 0x22a   :  { %2291 = vrcp.f32 %v748_v48  ;;  %v916_v45 = vmul.f32 %v2282_v9, %v2661_v18 }
 0x22b   :  { %2163 = vmatmul.mubr.msk.f32.vlgmr.msra.gmra.mrb[8].mxu0 %vm688_vm3, %v769_v30  ;;  %v921_v20 = vsel %vm688_vm3, %v769_v30, 0.0  ;;  %2293 = vrcp.f32 %v897_v28 }
 0x22c   :  { %v2284_v24 = vpop.eup %2283  ;;  %2171 = vmatpush3.xpose.msk.msra.mxu0 %vm688_vm3, %v915_v6  ;;  %2172 = vmatprep.mubr.msk.f32.mxu0 %vm2397_vm0, %v2398_v1  ;;  %v922_v27 = vrot.slane %v921_v20, 4  ;;  %2295 = vrcp.f32 %v904_v50  ;;  %v2036_v6 = vld [vmem:[%s2906_s3 + $0x4] ss:$0 sm:$0xff] }
 0x22d   :  { %v770_v37 = vmul.f32 %v2284_v24, %v2587_v43  ;;  %v751_v41 = vpop.xlane.xlu0 %750  ;;  %2180 = vmatprep.subr.mxu0 %v2398_v1  ;;  %v2286_v54 = vpop.eup %2285 }
 0x22e   :  { %v754_v31 = vpop.xlane.xlu1 %753  ;;  %2297 = vrcp.f32 %v751_v41  ;;  %v923_v51 = vadd.f32 %v922_v27, %v921_v20  ;;  %v917_v18 = vmul.f32 %v2286_v54, %v2667_v22 }
 0x22f   :  { %2299 = vrcp.f32 %v754_v31  ;;  %2168 = vmatmul.mubr.msk.f32.vlgmr.msra.gmra.mrb[8].mxu1 %vm688_vm3, %v770_v37  ;;  %v928_v4 = vsel %vm688_vm3, %v770_v37, 0.0  ;;  %v2038_v31 = vld [vmem:[%s2906_s3 + $0x6] ss:$0 sm:$0xff] }
 0x230   :  { %v2288_v8 = vpop.eup %2287  ;;  %2176 = vmatpush3.xpose.msk.msra.mxu1 %vm688_vm3, %v916_v45  ;;  %2177 = vmatprep.mubr.msk.f32.mxu1 %vm2397_vm0, %v2398_v1  ;;  %v924_v43 = vrot.slane %v923_v51, 2  ;;  %v929_v32 = vrot.slane %v928_v4, 4 }
 0x231   :  { %v2699_v33 = vmul.f32 %v2288_v8, %v2591_v49  ;;  %2185 = vmatprep.subr.mxu1 %v2398_v1  ;;  %v2290_v39 = vpop.eup %2289 }
 0x232   :  { %v925_v34 = vadd.f32 %v924_v43, %v923_v51  ;;  %v930_v38 = vadd.f32 %v929_v32, %v928_v4  ;;  %v918_v46 = vmul.f32 %v2290_v39, %v2671_v29  ;;  %v2039_v43 = vld [vmem:[%s2906_s3 + $0x7] ss:$0 sm:$0xff] }
 0x233   :  { %2173 = vmatmul.mubr.msk.f32.vlgmr.msra.gmra.mrb[10].mxu0 %vm688_vm3, %v2699_v33 }
 0x234   :  { %v2292_v35 = vpop.eup %2291  ;;  %2181 = vmatpush3.xpose.msk.msra.mxu0 %vm688_vm3, %v917_v18  ;;  %2182 = vmatprep.mubr.msk.f32.mxu0 %vm2397_vm0, %v2398_v1  ;;  %v926_v40 = vrot.slane %v925_v34, 1  ;;  %v931_v36 = vrot.slane %v930_v38, 2 }
 0x235   :  { %v2709_v49 = vmul.f32 %v2292_v35, %v2597_v58  ;;  %v757_v42 = vpop.xlane.xlu0 %756  ;;  %2190 = vmatprep.subr.mxu0 %v2398_v1  ;;  %v2294_v22 = vpop.eup %2293  ;;  %v2033_v58 = vld [vmem:[%s2906_s3 + $0x1] ss:$0 sm:$0xff] }
 0x236   :  { %v760_v44 = vpop.xlane.xlu1 %759  ;;  %2301 = vrcp.f32 %v757_v42  ;;  %v927_v47 = vadd.f32 %v926_v40, %v925_v34  ;;  %v932_v52 = vadd.f32 %v931_v36, %v930_v38  ;;  %v2296_v53 = vpop.eup %2295  ;;  %v919_v0 = vmul.f32 %v2294_v22, %v2673_v2 }
 0x237   :  { %2303 = vrcp.f32 %v760_v44  ;;  %2178 = vmatmul.mubr.msk.f32.vlgmr.msra.gmra.mrb[10].mxu1 %vm688_vm3, %v2709_v49  ;;  %v920_v11 = vmul.f32 %v2296_v53, %v2677_v5  ;;  %v935_v44 = vsel %vm688_vm3, %v2699_v33, 0.0 }
 0x238   :  { %v2298_v55 = vpop.eup %2297  ;;  %2186 = vmatpush3.xpose.msk.msra.mxu1 %vm688_vm3, %v918_v46  ;;  %2187 = vmatprep.mubr.msk.f32.mxu1 %vm2397_vm0, %v2398_v1  ;;  %v977_v56 = vmul.f32 0.125, %v927_v47  ;;  %v933_v57 = vrot.slane %v932_v52, 1  ;;  %v942_v46 = vsel %vm688_vm3, %v2709_v49, 0.0  ;;  %v936_v47 = vrot.slane %v935_v44, 4 }
 0x239   :  { %v2300_v29 = vpop.eup %2299  ;;  %v2722_v59 = vmul.f32 %v2298_v55, %v2601_v62  ;;  %2195 = vmatprep.subr.mxu1 %v2398_v1  ;;  %v2032_v62 = vld [vmem:[%s2906_s3] ss:$0 sm:$0xff] }
 0x23a   :  { %v2726_v60 = vmul.f32 %v2300_v29, %v2603_v63  ;;  %v1070_v61 = vpop.permute.xlu1 %1069  ;;  %v934_v3 = vadd.f32 %v933_v57, %v932_v52  ;;  %v2034_v63 = vld [vmem:[%s2906_s3 + $0x2] ss:$0 sm:$0xff]  ;;  %v985_v12 = vadd.f32 1e-08, %v977_v56  ;;  %v937_v55 = vadd.f32 %v936_v47, %v935_v44 }
 0x23b   :  { %vm1122_vm5 = vcmp.eq.s32.totalorder %v1070_v61, %v2033_v58  ;;  %2183 = vmatmul.mubr.msk.f32.vlgmr.msra.gmra.mrb[12].mxu0 %vm688_vm3, %v2722_v59  ;;  %v949_v53 = vsel %vm688_vm3, %v2722_v59, 0.0 }
 0x23c   :  { %2188 = vmatmul.mubr.msk.f32.vlgmr.msra.gmra.mrb[12].mxu1 %vm688_vm3, %v2726_v60  ;;  %2191 = vmatpush3.xpose.msk.msra.mxu0 %vm688_vm3, %v919_v0  ;;  %v2742_v2 = vsel %vm1122_vm5, 1.0, %v2398_v1  ;;  %v978_v13 = vmul.f32 0.125, %v934_v3  ;;  %2305 = vlog2.f32 %v985_v12  ;;  %v956_v52 = vsel %vm688_vm3, %v2726_v60, 0.0 }
 0x23d   :  { %2196 = vmatpush3.xpose.msk.msra.mxu1 %vm688_vm3, %v920_v11  ;;  %2192 = vmatprep.mubr.msk.f32.mxu0 %vm2397_vm0, %v2398_v1  ;;  %v1149_v5 = vsel %vm1145_vm4, %v2742_v2, 0.0  ;;  %v1067_v14 = vpop.permute.xlu0 %1066  ;;  %v957_v56 = vrot.slane %v956_v52, 4  ;;  %v950_v57 = vrot.slane %v949_v53, 4  ;;  %v938_v49 = vrot.slane %v937_v55, 2 }
 0x23e   :  { %v1073_v15 = vpop.permute.xlu1 %1072  ;;  %2197 = vmatprep.mubr.msk.f32.mxu1 %vm2397_vm0, %v2398_v1  ;;  %1150 = vadd.xlane.f32.xlu0 %v1149_v5  ;;  %vm1121_vm6 = vcmp.eq.s32.totalorder %v1067_v14, %v2032_v62  ;;  %v986_v25 = vadd.f32 1e-08, %v978_v13 }
 0x23f   :  { %vm1123_vm7 = vcmp.eq.s32.totalorder %v1073_v15, %v2034_v63  ;;  %v2752_v16 = vsel %vm1121_vm6, 1.0, %v2398_v1  ;;  %v958_v62 = vadd.f32 %v957_v56, %v956_v52  ;;  %v951_v59 = vadd.f32 %v950_v57, %v949_v53 }
 0x240   :  { %v2302_v17 = vpop.eup %2301  ;;  %v2758_v21 = vsel %vm1123_vm7, 1.0, %v2398_v1  ;;  %v1146_v23 = vsel %vm1145_vm4, %v2752_v16, 0.0  ;;  %2307 = vlog2.f32 %v986_v25  ;;  %v939_v15 = vadd.f32 %v938_v49, %v937_v55 }
 0x241   :  { %v2304_v26 = vpop.eup %2303  ;;  %v775_v28 = vmul.f32 %v2302_v17, %v2609_v7  ;;  %v1152_v30 = vsel %vm1145_vm4, %v2758_v21, 0.0  ;;  %1147 = vadd.xlane.f32.xlu1 %v1146_v23  ;;  %v959_v23 = vrot.slane %v958_v62, 2  ;;  %v952_v25 = vrot.slane %v951_v59, 2 }
 0x242   :  { %v776_v48 = vmul.f32 %v2304_v26, %v2611_v10  ;;  %v1076_v50 = vpop.permute.xlu1 %1075  ;;  %1153 = vadd.xlane.f32.xlu0 %v1152_v30  ;;  %v2037_v10 = vld [vmem:[%s2906_s3 + $0x5] ss:$0 sm:$0xff] }
 0x243   :  { %vm1124_vm8 = vcmp.eq.s32.totalorder %v1076_v50, %v2035_v19  ;;  %2193 = vmatmul.mubr.msk.f32.vlgmr.msra.gmra.mrb[14].mxu0 %vm688_vm3, %v775_v28  ;;  %v963_v61 = vsel %vm688_vm3, %v775_v28, 0.0 }
 0x244   :  { %2198 = vmatmul.mubr.msk.f32.vlgmr.msra.gmra.mrb[14].mxu1 %vm688_vm3, %v776_v48  ;;  %v2772_v9 = vsel %vm1124_vm8, 1.0, %v2398_v1  ;;  %v970_v11 = vsel %vm688_vm3, %v776_v48, 0.0  ;;  %v964_v63 = vrot.slane %v963_v61, 4 }
 0x245   :  { %v1155_v7 = vsel %vm1145_vm4, %v2772_v9, 0.0  ;;  %v971_v13 = vrot.slane %v970_v11, 4 }
 0x246   :  { %v1079_v20 = vpop.permute.xlu1 %1078  ;;  %1156 = vadd.xlane.f32.xlu1 %v1155_v7  ;;  %v2306_v37 = vpop.eup %2305  ;;  %v965_v26 = vadd.f32 %v964_v63, %v963_v61 }
 0x247   :  { %vm1125_vm9 = vcmp.eq.s32.totalorder %v1079_v20, %v2036_v6  ;;  %v994_v54 = vmul.f32 0.6931472, %v2306_v37  ;;  %v972_v30 = vadd.f32 %v971_v13, %v970_v11  ;;  %v940_v6 = vrot.slane %v939_v15, 1 }
 0x248   :  { %v2780_v24 = vsel %vm1125_vm9, 1.0, %v2398_v1  ;;  %v960_v20 = vadd.f32 %v959_v23, %v958_v62 }
 0x249   :  { %v1158_v27 = vsel %vm1145_vm4, %v2780_v24, 0.0  ;;  %v1009_v34 = vsub.f32 -2.7725887, %v994_v54 }
 0x24a   :  { %v1082_v41 = vpop.permute.xlu1 %1081  ;;  %1159 = vadd.xlane.f32.xlu0 %v1158_v27  ;;  %v2308_v4 = vpop.eup %2307  ;;  %v966_v27 = vrot.slane %v965_v26, 2 }
 0x24b   :  { %vm1126_vm10 = vcmp.eq.s32.totalorder %v1082_v41, %v2037_v10  ;;  %v996_v38 = vmul.f32 0.6931472, %v2308_v4  ;;  %v1017_v40 = vsel %vm688_vm3, %v1009_v34, 0.0  ;;  %v953_v10 = vadd.f32 %v952_v25, %v951_v59 }
 0x24c   :  { %v2788_v45 = vsel %vm1126_vm10, 1.0, %v2398_v1 }
 0x24d   :  { %v1161_v51 = vsel %vm1145_vm4, %v2788_v45, 0.0  ;;  %v1010_v42 = vsub.f32 -2.7725887, %v996_v38 }
 0x24e   :  { %v1085_v8 = vpop.permute.xlu1 %1084  ;;  %1162 = vadd.xlane.f32.xlu1 %v1161_v51  ;;  %v973_v51 = vrot.slane %v972_v30, 2 }
 0x24f   :  { %vm1127_vm11 = vcmp.eq.s32.totalorder %v1085_v8, %v2038_v31  ;;  %v1020_v22 = vsel %vm688_vm3, %v1010_v42, 0.0 }
 0x250   :  { %v2796_v32 = vsel %vm1127_vm11, 1.0, %v2398_v1  ;;  %v974_v44 = vadd.f32 %v973_v51, %v972_v30 }
 0x251   :  { %v1164_v18 = vsel %vm1145_vm4, %v2796_v32, 0.0 }
 0x252   :  { %v1088_v39 = vpop.permute.xlu1 %1087  ;;  %1165 = vadd.xlane.f32.xlu0 %v1164_v18  ;;  %v975_v59 = vrot.slane %v974_v44, 1 }
 0x253   :  { %vm1128_vm12 = vcmp.eq.s32.totalorder %v1088_v39, %v2039_v43  ;;  %v941_v43 = vadd.f32 %v940_v6, %v939_v15  ;;  %v961_v39 = vrot.slane %v960_v20, 1 }
 0x254   :  { %v2801_v35 = vsel %vm1128_vm12, 1.0, %v2398_v1  ;;  %v943_v1 = vrot.slane %v942_v46, 4 }
 0x255   :  { %v1167_v36 = vsel %vm1145_vm4, %v2801_v35, 0.0  ;;  %v979_v53 = vmul.f32 0.125, %v941_v43 }
 0x256   :  { %1018 = vadd.xlane.f32.xlu0 %v1017_v40  ;;  %1168 = vadd.xlane.f32.xlu1 %v1167_v36  ;;  %v944_v58 = vadd.f32 %v943_v1, %v942_v46  ;;  %v954_v40 = vrot.slane %v953_v10, 1  ;;  %v967_v36 = vadd.f32 %v966_v27, %v965_v26 }
 0x258   :  { %v945_v60 = vrot.slane %v944_v58, 2  ;;  %v968_v49 = vrot.slane %v967_v36, 1 }
 0x25a   :  { %1021 = vadd.xlane.f32.xlu1 %v1020_v22  ;;  %v946_v19 = vadd.f32 %v945_v60, %v944_v58  ;;  %v969_v25 = vadd.f32 %v968_v49, %v967_v36 }
 0x25c   :  { %v947_v7 = vrot.slane %v946_v19, 1 }
 0x25e   :  { %v948_v34 = vadd.f32 %v947_v7, %v946_v19 }
 0x2cb   :  { %v2820_v17 = vpop.xlane.xlu0 %1150 }
 0x2ce   :  { %v2816_v0 = vpop.xlane.xlu1 %1147 }
 0x2cf   :  { %2309 = vrcp.f32 %v2816_v0  ;;  %v2823_v41 = vpop.xlane.xlu0 %1153 }
 0x2d3   :  { %v2826_v38 = vpop.xlane.xlu1 %1156 }
 0x2d7   :  { %v2830_v11 = vpop.xlane.xlu0 %1159 }
 0x2d9   :  { %v2310_v37 = vpop.eup %2309 }
 0x2fe   :  { %v1250_v29 = vpop.f32.mrb[8].mxu0 }
 0x2ff   :  { %v1251_v33 = vadd.f32 1e-08, %v1250_v29  ;;  %v2164_v3 = vpop.f32.mrb[9].mxu0  ;;  %v980_v29 = vmul.f32 0.125, %v948_v34 }
 0x300   :  { %v955_v3 = vadd.f32 %v954_v40, %v953_v10 }
 0x301   :  { %2311 = vlog2.f32 %v1251_v33  ;;  %v962_v33 = vadd.f32 %v961_v39, %v960_v20 }
 0x302   :  { %v1326_v12 = vpop.f32.mrb[8].mxu1  ;;  %v981_v23 = vmul.f32 0.125, %v955_v3 }
 0x303   :  { %v1327_v5 = vadd.f32 1e-08, %v1326_v12  ;;  %v2169_v14 = vpop.f32.mrb[9].mxu1  ;;  %v2834_v12 = vpop.xlane.xlu1 %1162  ;;  %v982_v19 = vmul.f32 0.125, %v962_v33 }
 0x304   :  { %v988_v14 = vadd.f32 1e-08, %v980_v29 }
 0x305   :  { %2313 = vlog2.f32 %v1327_v5  ;;  %v990_v51 = vadd.f32 1e-08, %v982_v19 }
 0x306   :  { %v1402_v28 = vpop.f32.mrb[10].mxu0  ;;  %2315 = vrcp.f32 %v2820_v17 }
 0x307   :  { %v1403_v48 = vadd.f32 1e-08, %v1402_v28  ;;  %v2174_v50 = vpop.f32.mrb[11].mxu0  ;;  %v2844_v40 = vpop.xlane.xlu1 %1168 }
 0x309   :  { %2317 = vlog2.f32 %v1403_v48  ;;  %v976_v48 = vadd.f32 %v975_v59, %v974_v44 }
 0x30a   :  { %v1478_v31 = vpop.f32.mrb[10].mxu1  ;;  %2319 = vrcp.f32 %v2823_v41 }
 0x30b   :  { %v2312_v54 = vpop.eup %2311  ;;  %v1479_v4 = vadd.f32 1e-08, %v1478_v31  ;;  %v2179_v8 = vpop.f32.mrb[11].mxu1  ;;  %v984_v34 = vmul.f32 0.125, %v976_v48 }
 0x30c   :  { %v1787_v18 = vmul.f32 0.6931472, %v2312_v54  ;;  %v989_v54 = vadd.f32 1e-08, %v981_v23  ;;  %v2840_v8 = vpop.xlane.xlu0 %1165 }
 0x30d   :  { %2321 = vlog2.f32 %v1479_v4  ;;  %v983_v4 = vmul.f32 0.125, %v969_v25 }
 0x30e   :  { %v1554_v42 = vpop.f32.mrb[12].mxu0  ;;  %v1874_v22 = vmul.f32 %v2310_v37, %v1787_v18  ;;  %2323 = vrcp.f32 %v2826_v38 }
 0x30f   :  { %v2314_v46 = vpop.eup %2313  ;;  %v1555_v47 = vadd.f32 1e-08, %v1554_v42  ;;  %v1630_v1 = vpop.f32.mrb[12].mxu1 }
 0x310   :  { %v2184_v52 = vpop.f32.mrb[13].mxu0  ;;  %v1789_v55 = vmul.f32 0.6931472, %v2314_v46  ;;  %v1631_v58 = vadd.f32 1e-08, %v1630_v1  ;;  %v2189_v56 = vpop.f32.mrb[13].mxu1  ;;  %v1882_v57 = vmul.f32 %v2752_v16, %v1874_v22 }
 0x311   :  { %v2316_v61 = vpop.eup %2315  ;;  %2325 = vlog2.f32 %v1555_v47  ;;  %v987_v16 = vadd.f32 1e-08, %v979_v53  ;;  %v991_v46 = vadd.f32 1e-08, %v983_v4  ;;  %v992_v53 = vadd.f32 1e-08, %v984_v34 }
 0x312   :  { %2327 = vlog2.f32 %v1631_v58  ;;  %v1890_v60 = vsel %vm1145_vm4, %v1882_v57, 0.0  ;;  %v1875_v62 = vmul.f32 %v2316_v61, %v1789_v55 }
 0x313   :  { %v2318_v63 = vpop.eup %2317  ;;  %2329 = vrcp.f32 %v2830_v11  ;;  %1891 = vadd.xlane.f32.xlu0 %v1890_v60 }
 0x314   :  { %2331 = vrcp.f32 %v2834_v12  ;;  %v1791_v13 = vmul.f32 0.6931472, %v2318_v63  ;;  %v1883_v5 = vmul.f32 %v2742_v2, %v1875_v62  ;;  %v2320_v15 = vpop.eup %2319 }
 0x315   :  { %2333 = vlog2.f32 %v987_v16 }
 0x316   :  { %v1706_v26 = vpop.f32.mrb[14].mxu0  ;;  %v1893_v28 = vsel %vm1145_vm4, %v1883_v5, 0.0  ;;  %v1876_v30 = vmul.f32 %v2320_v15, %v1791_v13  ;;  %2335 = vlog2.f32 %v988_v14 }
 0x317   :  { %v2322_v50 = vpop.eup %2321  ;;  %v1707_v6 = vadd.f32 1e-08, %v1706_v26  ;;  %v1782_v7 = vpop.f32.mrb[14].mxu1  ;;  %1894 = vadd.xlane.f32.xlu1 %v1893_v28 }
 0x318   :  { %v2194_v20 = vpop.f32.mrb[15].mxu0  ;;  %v1793_v10 = vmul.f32 0.6931472, %v2322_v50  ;;  %v1783_v27 = vadd.f32 1e-08, %v1782_v7  ;;  %v2199_v37 = vpop.f32.mrb[15].mxu1  ;;  %v1884_v2 = vmul.f32 %v2758_v21, %v1876_v30 }
 0x319   :  { %v2324_v31 = vpop.eup %2323  ;;  %2337 = vlog2.f32 %v1707_v6 }
 0x31a   :  { %2339 = vlog2.f32 %v1783_v27  ;;  %v1896_v43 = vsel %vm1145_vm4, %v1884_v2, 0.0  ;;  %v1877_v18 = vmul.f32 %v2324_v31, %v1793_v10 }
 0x31b   :  { %v2326_v39 = vpop.eup %2325  ;;  %2341 = vrcp.f32 %v2840_v8  ;;  %1897 = vadd.xlane.f32.xlu0 %v1896_v43 }
 0x31c   :  { %v2328_v21 = vpop.eup %2327  ;;  %2343 = vrcp.f32 %v2844_v40  ;;  %v1795_v36 = vmul.f32 0.6931472, %v2326_v39  ;;  %v1885_v42 = vmul.f32 %v2772_v9, %v1877_v18 }
 0x31d   :  { %v2330_v22 = vpop.eup %2329  ;;  %v1797_v44 = vmul.f32 0.6931472, %v2328_v21  ;;  %2345 = vlog2.f32 %v989_v54 }
 0x31e   :  { %v2332_v47 = vpop.eup %2331  ;;  %v1899_v1 = vsel %vm1145_vm4, %v1885_v42, 0.0  ;;  %v1878_v52 = vmul.f32 %v2330_v22, %v1795_v36  ;;  %2347 = vlog2.f32 %v990_v51 }
 0x31f   :  { %1900 = vadd.xlane.f32.xlu1 %v1899_v1  ;;  %v1879_v55 = vmul.f32 %v2332_v47, %v1797_v44  ;;  %v2334_v56 = vpop.eup %2333  ;;  %2349 = vlog2.f32 %v991_v46 }
 0x320   :  { %v1886_v58 = vmul.f32 %v2780_v24, %v1878_v52  ;;  %v2336_v29 = vpop.eup %2335  ;;  %2351 = vlog2.f32 %v992_v53  ;;  %v998_v24 = vmul.f32 0.6931472, %v2334_v56 }
 0x321   :  { %v1887_v57 = vmul.f32 %v2788_v45, %v1879_v55  ;;  %v1000_v45 = vmul.f32 0.6931472, %v2336_v29  ;;  %2353 = vlog2.f32 %v2816_v0 }
 0x322   :  { %v1902_v9 = vsel %vm1145_vm4, %v1886_v58, 0.0  ;;  %v1011_v23 = vsub.f32 -2.7725887, %v998_v24  ;;  %2355 = vlog2.f32 %v2820_v17  ;;  %v1022_v58 = vpop.xlane.xlu1 %1021 }
 0x323   :  { %v2338_v61 = vpop.eup %2337  ;;  %v1905_v33 = vsel %vm1145_vm4, %v1887_v57, 0.0  ;;  %1903 = vadd.xlane.f32.xlu0 %v1902_v9  ;;  %v1012_v30 = vsub.f32 -2.7725887, %v1000_v45  ;;  %2357 = vlog2.f32 %v2823_v41 }
 0x324   :  { %v2340_v3 = vpop.eup %2339  ;;  %v1799_v49 = vmul.f32 0.6931472, %v2338_v61  ;;  %1906 = vadd.xlane.f32.xlu1 %v1905_v33  ;;  %v1023_v6 = vsel %vm688_vm3, %v1011_v23, 0.0  ;;  %2359 = vlog2.f32 %v2826_v38  ;;  %v1019_v38 = vpop.xlane.xlu0 %1018 }
 0x325   :  { %v2342_v60 = vpop.eup %2341  ;;  %v1801_v62 = vmul.f32 0.6931472, %v2340_v3  ;;  %2361 = vlog2.f32 %v2830_v11 }
 0x326   :  { %v2344_v59 = vpop.eup %2343  ;;  %v1880_v63 = vmul.f32 %v2342_v60, %v1799_v49  ;;  %2363 = vlog2.f32 %v2834_v12 }
 0x327   :  { %v2346_v16 = vpop.eup %2345  ;;  %v1881_v13 = vmul.f32 %v2344_v59, %v1801_v62  ;;  %2365 = vlog2.f32 %v2840_v8 }
 0x328   :  { %v2348_v5 = vpop.eup %2347  ;;  %v1888_v14 = vmul.f32 %v2796_v32, %v1880_v63  ;;  %v1002_v25 = vmul.f32 0.6931472, %v2346_v16  ;;  %v1026_v32 = vsel %vm688_vm3, %v1012_v30, 0.0  ;;  %2367 = vlog2.f32 %v2844_v40 }
 0x329   :  { %v1889_v15 = vmul.f32 %v2801_v35, %v1881_v13  ;;  %v2350_v26 = vpop.eup %2349  ;;  %v1004_v48 = vmul.f32 0.6931472, %v2348_v5  ;;  %v1041_v5 = vmul.f32 0.0625, %v1019_v38 }
 0x32a   :  { %v1908_v19 = vsel %vm1145_vm4, %v1888_v14, 0.0  ;;  %v2352_v50 = vpop.eup %2351  ;;  %v1013_v7 = vsub.f32 -2.7725887, %v1002_v25  ;;  %v1006_v20 = vmul.f32 0.6931472, %v2350_v26 }
 0x32b   :  { %v1911_v28 = vsel %vm1145_vm4, %v1889_v15, 0.0  ;;  %1909 = vadd.xlane.f32.xlu0 %v1908_v19  ;;  %v1014_v35 = vsub.f32 -2.7725887, %v1004_v48  ;;  %v1008_v10 = vmul.f32 0.6931472, %v2352_v50  ;;  %v2354_v4 = vpop.eup %2353 }
 0x32c   :  { %1912 = vadd.xlane.f32.xlu1 %v1911_v28  ;;  %v1029_v27 = vsel %vm688_vm3, %v1013_v7, 0.0  ;;  %v1015_v37 = vsub.f32 -2.7725887, %v1006_v20  ;;  %v2356_v43 = vpop.eup %2355  ;;  %v1803_v18 = vmul.f32 0.6931472, %v2354_v4 }
 0x32d   :  { %v1032_v2 = vsel %vm688_vm3, %v1014_v35, 0.0  ;;  %v1016_v31 = vsub.f32 -2.7725887, %v1008_v10  ;;  %v1805_v34 = vmul.f32 0.6931472, %v2356_v43  ;;  %v2358_v36 = vpop.eup %2357 }
 0x32e   :  { %v1035_v51 = vsel %vm688_vm3, %v1015_v37, 0.0  ;;  %v1818_v39 = vrot.slane %v1803_v18, 4  ;;  %v2360_v0 = vpop.eup %2359  ;;  %v1807_v41 = vmul.f32 0.6931472, %v2358_v36 }
 0x32f   :  { %1024 = vadd.xlane.f32.xlu0 %v1023_v6  ;;  %v1038_v54 = vsel %vm688_vm3, %v1016_v31, 0.0  ;;  %v1824_v21 = vrot.slane %v1805_v34, 4  ;;  %v2362_v44 = vpop.eup %2361  ;;  %v1809_v46 = vmul.f32 0.6931472, %v2360_v0 }
 0x330   :  { %1027 = vadd.xlane.f32.xlu1 %v1026_v32  ;;  %v1819_v42 = vadd.f32 %v1818_v39, %v1803_v18  ;;  %v2364_v47 = vpop.eup %2363  ;;  %v1830_v11 = vrot.slane %v1807_v41, 4  ;;  %v1811_v12 = vmul.f32 0.6931472, %v2362_v44  ;;  %v1978_v32 = vmul.f32 0.1, %v1041_v5 }
 0x331   :  { %v1825_v17 = vadd.f32 %v1824_v21, %v1805_v34  ;;  %v1836_v53 = vrot.slane %v1809_v46, 4  ;;  %v1813_v55 = vmul.f32 0.6931472, %v2364_v47  ;;  %v2366_v57 = vpop.eup %2365 }
 0x332   :  { %v1820_v22 = vrot.slane %v1819_v42, 2  ;;  %v1831_v9 = vadd.f32 %v1830_v11, %v1807_v41  ;;  %v2368_v40 = vpop.eup %2367  ;;  %v1842_v49 = vrot.slane %v1811_v12, 4  ;;  %v1815_v62 = vmul.f32 0.6931472, %v2366_v57 }
 0x333   :  { %1030 = vadd.xlane.f32.xlu0 %v1029_v27  ;;  %v1826_v1 = vrot.slane %v1825_v17, 2  ;;  %v1837_v3 = vadd.f32 %v1836_v53, %v1809_v46  ;;  %v1848_v60 = vrot.slane %v1813_v55, 4  ;;  %v1817_v45 = vmul.f32 0.6931472, %v2368_v40 }
 0x334   :  { %1033 = vadd.xlane.f32.xlu1 %v1032_v2  ;;  %v1821_v52 = vadd.f32 %v1820_v22, %v1819_v42  ;;  %v1832_v13 = vrot.slane %v1831_v9, 2  ;;  %v1843_v25 = vadd.f32 %v1842_v49, %v1811_v12  ;;  %v1854_v28 = vrot.slane %v1815_v62, 4 }
 0x335   :  { %v1827_v29 = vadd.f32 %v1826_v1, %v1825_v17  ;;  %v1838_v23 = vrot.slane %v1837_v3, 2  ;;  %v1849_v26 = vadd.f32 %v1848_v60, %v1813_v55  ;;  %v1860_v20 = vrot.slane %v1817_v45, 4 }
 0x336   :  { %v1822_v61 = vrot.slane %v1821_v52, 1  ;;  %v1833_v7 = vadd.f32 %v1832_v13, %v1831_v9  ;;  %v1855_v4 = vadd.f32 %v1854_v28, %v1815_v62  ;;  %v1042_v42 = vmul.f32 0.0625, %v1022_v58 }
 0x337   :  { %1036 = vadd.xlane.f32.xlu0 %v1035_v51  ;;  %v1828_v16 = vrot.slane %v1827_v29, 1  ;;  %v1839_v31 = vadd.f32 %v1838_v23, %v1837_v3  ;;  %v1844_v51 = vrot.slane %v1843_v25, 2  ;;  %v1861_v36 = vadd.f32 %v1860_v20, %v1817_v45 }
 0x338   :  { %1039 = vadd.xlane.f32.xlu1 %v1038_v54  ;;  %v1823_v14 = vadd.f32 %v1822_v61, %v1821_v52  ;;  %v1850_v54 = vrot.slane %v1849_v26, 2  ;;  %v1834_v17 = vrot.slane %v1833_v7, 1  ;;  %v1856_v52 = vrot.slane %v1855_v4, 2 }
 0x339   :  { %v1829_v35 = vadd.f32 %v1828_v16, %v1827_v29  ;;  %v1845_v38 = vadd.f32 %v1844_v51, %v1843_v25  ;;  %v1840_v11 = vrot.slane %v1839_v31, 1  ;;  %v1862_v57 = vrot.slane %v1861_v36, 2 }
 0x33a   :  { %v1866_v10 = vsub.f32 0.0, %v1823_v14  ;;  %v1851_v47 = vadd.f32 %v1850_v54, %v1849_v26  ;;  %v1835_v58 = vadd.f32 %v1834_v17, %v1833_v7  ;;  %v1979_v9 = vmul.f32 0.1, %v1042_v42 }
 0x33b   :  { %v1867_v0 = vsub.f32 0.0, %v1829_v35  ;;  %v1841_v60 = vadd.f32 %v1840_v11, %v1839_v31  ;;  %v1846_v62 = vrot.slane %v1845_v38, 1  ;;  %v1863_v13 = vadd.f32 %v1862_v57, %v1861_v36 }
 0x33c   :  { %v1852_v16 = vrot.slane %v1851_v47, 1 }
 0x33d   :  { %v1869_v28 = vsub.f32 0.0, %v1841_v60 }
 0x3a0   :  { %v1892_v56 = vpop.xlane.xlu0 %1891 }
 0x3a1   :  { %v1914_v8 = vrot.slane %v1892_v56, 4 }
 0x3a3   :  { %v1915_v33 = vadd.f32 %v1914_v8, %v1892_v56 }
 0x3a4   :  { %v1895_v59 = vpop.xlane.xlu1 %1894 }
 0x3a5   :  { %v1916_v63 = vrot.slane %v1915_v33, 2  ;;  %v1920_v24 = vrot.slane %v1895_v59, 4 }
 0x3a7   :  { %v1917_v15 = vadd.f32 %v1916_v63, %v1915_v33  ;;  %v1921_v19 = vadd.f32 %v1920_v24, %v1895_v59  ;;  %v1857_v59 = vadd.f32 %v1856_v52, %v1855_v4 }
 0x3a8   :  { %v1898_v30 = vpop.xlane.xlu0 %1897 }
 0x3a9   :  { %v1918_v48 = vrot.slane %v1917_v15, 1  ;;  %v1922_v50 = vrot.slane %v1921_v19, 2  ;;  %v1926_v6 = vrot.slane %v1898_v30, 4  ;;  %v1858_v7 = vrot.slane %v1857_v59, 1 }
 0x3ab   :  { %v1919_v27 = vadd.f32 %v1918_v48, %v1917_v15  ;;  %v1923_v37 = vadd.f32 %v1922_v50, %v1921_v19  ;;  %v1927_v2 = vadd.f32 %v1926_v6, %v1898_v30  ;;  %v1868_v15 = vsub.f32 0.0, %v1835_v58 }
 0x3ac   :  { %v1901_v43 = vpop.xlane.xlu1 %1900  ;;  %v1853_v50 = vadd.f32 %v1852_v16, %v1851_v47  ;;  %v1847_v6 = vadd.f32 %v1846_v62, %v1845_v38  ;;  %v1859_v17 = vadd.f32 %v1858_v7, %v1857_v59 }
 0x3ad   :  { %v1962_v18 = vsub.f32 %v1866_v10, %v1919_v27  ;;  %v1924_v34 = vrot.slane %v1923_v37, 1  ;;  %v1928_v39 = vrot.slane %v1927_v2, 2  ;;  %v1932_v21 = vrot.slane %v1901_v43, 4 }
 0x3ae   :  { %v1864_v10 = vrot.slane %v1863_v13, 1 }
 0x3af   :  { %v1970_v41 = vmul.f32 0.125, %v1962_v18  ;;  %v1925_v22 = vadd.f32 %v1924_v34, %v1923_v37  ;;  %v1929_v44 = vadd.f32 %v1928_v39, %v1927_v2  ;;  %v1933_v46 = vadd.f32 %v1932_v21, %v1901_v43 }
 0x3b0   :  { %v1904_v1 = vpop.xlane.xlu0 %1903  ;;  %v1871_v39 = vsub.f32 0.0, %v1853_v50  ;;  %v1870_v21 = vsub.f32 0.0, %v1847_v6 }
 0x3b1   :  { %v1986_v53 = vadd.f32 %v1978_v32, %v1970_v41  ;;  %v1963_v12 = vsub.f32 %v1867_v0, %v1925_v22  ;;  %v1934_v55 = vrot.slane %v1933_v46, 2  ;;  %v1907_v56 = vpop.xlane.xlu1 %1906  ;;  %v1938_v29 = vrot.slane %v1904_v1, 4 }
 0x3b2   :  { %v1944_v8 = vrot.slane %v1907_v56, 4  ;;  %v1930_v61 = vrot.slane %v1929_v44, 1  ;;  %v1865_v0 = vadd.f32 %v1864_v10, %v1863_v13 }
 0x3b3   :  { %1995 = vst.msk [vmem:[%s2907_s4] sm:$0x1] %vm1994_vm13, %v1986_v53  ;;  %v1971_v40 = vmul.f32 0.125, %v1963_v12  ;;  %v1935_v33 = vadd.f32 %v1934_v55, %v1933_v46  ;;  %v1939_v49 = vadd.f32 %v1938_v29, %v1904_v1 }
 0x3b4   :  { %v1945_v3 = vadd.f32 %v1944_v8, %v1907_v56  ;;  %v1931_v14 = vadd.f32 %v1930_v61, %v1929_v44  ;;  %v1872_v61 = vsub.f32 0.0, %v1859_v17  ;;  %v1873_v60 = vsub.f32 0.0, %v1865_v0 }
 0x3b5   :  { %v1987_v63 = vadd.f32 %v1979_v9, %v1971_v40  ;;  %v1936_v24 = vrot.slane %v1935_v33, 1  ;;  %v1940_v5 = vrot.slane %v1939_v49, 2 }
 0x3b6   :  { %v1946_v45 = vrot.slane %v1945_v3, 2  ;;  %v1964_v37 = vsub.f32 %v1868_v15, %v1931_v14 }
 0x3b7   :  { %1996 = vst.msk [vmem:[%s2907_s4 + $0x1] sm:$0x1] %vm1994_vm13, %v1987_v63  ;;  %v1937_v19 = vadd.f32 %v1936_v24, %v1935_v33  ;;  %v1941_v25 = vadd.f32 %v1940_v5, %v1939_v49 }
 0x3b8   :  { %v1947_v23 = vadd.f32 %v1946_v45, %v1945_v3  ;;  %v1910_v26 = vpop.xlane.xlu0 %1909  ;;  %v1972_v22 = vmul.f32 0.125, %v1964_v37 }
 0x3b9   :  { %v1913_v30 = vpop.xlane.xlu1 %1912  ;;  %v1950_v48 = vrot.slane %v1910_v26, 4  ;;  %v1942_v32 = vrot.slane %v1941_v25, 1  ;;  %v1965_v54 = vsub.f32 %v1869_v28, %v1937_v19 }
 0x3ba   :  { %v1948_v20 = vrot.slane %v1947_v23, 1  ;;  %v1956_v35 = vrot.slane %v1913_v30, 4 }
 0x3bb   :  { %v1951_v27 = vadd.f32 %v1950_v48, %v1910_v26  ;;  %v1943_v31 = vadd.f32 %v1942_v32, %v1941_v25  ;;  %v1973_v47 = vmul.f32 0.125, %v1965_v54 }
 0x3bc   :  { %v1949_v2 = vadd.f32 %v1948_v20, %v1947_v23  ;;  %v1957_v51 = vadd.f32 %v1956_v35, %v1913_v30  ;;  %v1025_v4 = vpop.xlane.xlu0 %1024 }
 0x3bd   :  { %v1952_v43 = vrot.slane %v1951_v27, 2  ;;  %v1028_v18 = vpop.xlane.xlu1 %1027  ;;  %v1043_v34 = vmul.f32 0.0625, %v1025_v4  ;;  %v1966_v46 = vsub.f32 %v1870_v21, %v1943_v31 }
 0x3be   :  { %v1958_v36 = vrot.slane %v1957_v51, 2  ;;  %v1044_v42 = vmul.f32 0.0625, %v1028_v18  ;;  %v1967_v11 = vsub.f32 %v1871_v39, %v1949_v2 }
 0x3bf   :  { %v1953_v41 = vadd.f32 %v1952_v43, %v1951_v27  ;;  %v1980_v44 = vmul.f32 0.1, %v1043_v34  ;;  %v1974_v9 = vmul.f32 0.125, %v1966_v46 }
 0x3c0   :  { %v1959_v38 = vadd.f32 %v1958_v36, %v1957_v51  ;;  %v1981_v1 = vmul.f32 0.1, %v1044_v42  ;;  %v1031_v52 = vpop.xlane.xlu0 %1030  ;;  %v1975_v3 = vmul.f32 0.125, %v1967_v11 }
 0x3c1   :  { %v1954_v53 = vrot.slane %v1953_v41, 1  ;;  %v1988_v12 = vadd.f32 %v1980_v44, %v1972_v22  ;;  %v1034_v55 = vpop.xlane.xlu1 %1033  ;;  %v1045_v56 = vmul.f32 0.0625, %v1031_v52 }
 0x3c2   :  { %v1960_v57 = vrot.slane %v1959_v38, 1  ;;  %v1989_v8 = vadd.f32 %v1981_v1, %v1973_v47  ;;  %v1046_v29 = vmul.f32 0.0625, %v1034_v55 }
 0x3c3   :  { %v1955_v58 = vadd.f32 %v1954_v53, %v1953_v41  ;;  %1997 = vst.msk [vmem:[%s2907_s4 + $0x2] sm:$0x1] %vm1994_vm13, %v1988_v12  ;;  %v1982_v40 = vmul.f32 0.1, %v1045_v56 }
 0x3c4   :  { %v1961_v33 = vadd.f32 %v1960_v57, %v1959_v38  ;;  %1998 = vst.msk [vmem:[%s2907_s4 + $0x3] sm:$0x1] %vm1994_vm13, %v1989_v8  ;;  %v1983_v49 = vmul.f32 0.1, %v1046_v29  ;;  %v1037_v62 = vpop.xlane.xlu0 %1036 }
 0x3c5   :  { %v1990_v59 = vadd.f32 %v1982_v40, %v1974_v9  ;;  %v1040_v63 = vpop.xlane.xlu1 %1039  ;;  %v1968_v24 = vsub.f32 %v1872_v61, %v1955_v58  ;;  %v1047_v16 = vmul.f32 0.0625, %v1037_v62 }
 0x3c6   :  { %v1991_v13 = vadd.f32 %v1983_v49, %v1975_v3  ;;  %v1969_v45 = vsub.f32 %v1873_v60, %v1961_v33  ;;  %v1048_v5 = vmul.f32 0.0625, %v1040_v63 }
 0x3c7   :  { %1999 = vst.msk [vmem:[%s2907_s4 + $0x4] sm:$0x1] %vm1994_vm13, %v1990_v59  ;;  %v1976_v14 = vmul.f32 0.125, %v1968_v24  ;;  %v1984_v15 = vmul.f32 0.1, %v1047_v16 }
 0x3c8   :  { %2000 = vst.msk [vmem:[%s2907_s4 + $0x5] sm:$0x1] %vm1994_vm13, %v1991_v13  ;;  %v1977_v19 = vmul.f32 0.125, %v1969_v45  ;;  %v1985_v23 = vmul.f32 0.1, %v1048_v5 }
 0x3c9   :  { %v1992_v25 = vadd.f32 %v1984_v15, %v1976_v14 }
 0x3ca   :  { %v1993_v26 = vadd.f32 %v1985_v23, %v1977_v19 }
 0x3cb   :  { %2001 = vst.msk [vmem:[%s2907_s4 + $0x6] sm:$0x1] %vm1994_vm13, %v1992_v25 }
 0x3cc   :  { %2002 = vst.msk [vmem:[%s2907_s4 + $0x7] sm:$0x1] %vm1994_vm13, %v1993_v26 }
 0x3cd   :  { %2007 = vsyncpa [#allocation3], 1 }

</bundles_post_ra>
